<compile_context>
chip_gen: v6e
topology: v6e:2x2x1
jax: 0.10.0
libtpu: 0.0.40
codegen_flags: <defaults>
</compile_context>

<pallas_src>
import jax
import jax.numpy as jnp
from jax import lax
from jax.experimental import pallas as pl
from jax.experimental.pallas import tpu as pltpu

# ----------------------------- configuration -------------------------------
VOCAB_SIZE = 100
TAG_SIZE = 4
EMB = 32
HID = 32
NUM_DIRECTION = 2
BATCH = 2          # spec batch; up to 8 would still be one vreg of state.
SEQ = 8

VPAD = 128                      # vocab padded to lane width
G4 = 4 * HID                    # 128 gate lanes
PACK_COLS = G4                  # packed-weight slab width

# Packed-weight row offsets (all multiples of 8 -> sublane-tile aligned).
OFF_WF = 0                      # (VPAD, 4H)  emb_pad @ Wih_f.T  (embedding folded in)
OFF_WB = OFF_WF + VPAD          # (VPAD, 4H)  emb_pad @ Wih_b.T
OFF_WHH = OFF_WB + VPAD         # (H,   4H)  Whh_f.T
OFF_BF = OFF_WHH + HID          # row: bih_f + bhh_f
OFF_BB = OFF_BF + 8             # row: bih_b + bhh_b
OFF_FCF = OFF_BB + 8            # (H, 4H) fc weight fwd half in cols 0:TAG
OFF_FCB = OFF_FCF + HID         # (H, 4H) fc weight bwd half in cols 0:TAG
OFF_BFC = OFF_FCB + HID         # row: fc bias in cols 0:TAG
PACK_ROWS = OFF_BFC + 8         # 376 rows -> ~188 KiB f32


# ------------------------------ Pallas kernel ------------------------------
def lstm_fc_kernel(tok_ref,     # (SEQ*BATCH, 1) int32, time-major flattened tokens
                   w_ref,       # (PACK_ROWS, PACK_COLS) f32 packed weights
                   out_ref):    # (BATCH, TAG_SIZE) f32 logits
    sb = tok_ref.shape[0]       # SEQ * BATCH

    # ---- fused embedding gather: exact one-hot (1.0/0.0 is exact) ---------
    tok = tok_ref[...]                                           # (S*B, 1)
    col = lax.broadcasted_iota(jnp.int32, (sb, VPAD), 1)         # (S*B, 128)
    onehot = (col == tok).astype(jnp.float32)                    # exact rows

    # ---- hoisted, non-recurrent work ---------------------------------------
    # Forward input->hidden pre-activations for every timestep, time-major,
    # biases folded in.  One 128-wide MXU pass (single pass even on v5e).
    w_f = w_ref[OFF_WF:OFF_WF + VPAD, :]                         # (128, 128)
    b_f = w_ref[OFF_BF:OFF_BF + 1, :]                            # (1, 128)
    xz_f = jnp.dot(onehot, w_f,
                   preferred_element_type=jnp.float32) + b_f     # (S*B, 128)

    whh = w_ref[OFF_WHH:OFF_WHH + HID, :]                        # hoisted weight load

    def gates(z):
        # PyTorch gate order i, f, g, o.  Sigmoid once over the full 4H-wide
        # vreg (single EUP pass); tanh on the g slice.
        sg = jax.nn.sigmoid(z)
        g = jnp.tanh(z[:, 2 * HID:3 * HID])
        return (sg[:, 0:HID], sg[:, HID:2 * HID], g, sg[:, 3 * HID:4 * HID])

    # ---- forward direction: serial recurrence, fully unrolled --------------
    h = jnp.zeros((BATCH, HID), jnp.float32)
    c = jnp.zeros((BATCH, HID), jnp.float32)
    for t in range(SEQ):                                         # static unroll
        z = xz_f[t * BATCH:(t + 1) * BATCH, :] + jnp.dot(
            h, whh, preferred_element_type=jnp.float32)
        i_g, f_g, g_g, o_g = gates(z)
        c = f_g * c + i_g * g_g
        h = o_g * jnp.tanh(c)

    # ---- backward direction -------------------------------------------------
    # The module keeps only out[-1]; there the backward hidden equals exactly
    # one cell step on x[S-1] from a zero state; with h_prev = 0 the h @ Whh_b
    # term vanishes, so no recurrent matmul and Whh_b is never shipped.
    # NOTE: valid only because the consumer reads the last timestep of a
    # full-length, unpadded sequence.
    w_b = w_ref[OFF_WB:OFF_WB + VPAD, :]                         # (128, 128)
    b_b = w_ref[OFF_BB:OFF_BB + 1, :]                            # (1, 128)
    oh_last = onehot[(SEQ - 1) * BATCH:SEQ * BATCH, :]           # (B, 128)
    zb = jnp.dot(oh_last, w_b, preferred_element_type=jnp.float32) + b_b
    i_b, f_b, g_b, o_b = gates(zb)
    c_b = i_b * g_b                                              # f_b * 0 + i_b * g_b
    h_b = o_b * jnp.tanh(c_b)

    # ---- fully connected (split fwd/bwd weights -> no (B, 2H) concat) ------
    wfc_f = w_ref[OFF_FCF:OFF_FCF + HID, :]                      # (32, 128), cols 4: are 0
    wfc_b = w_ref[OFF_FCB:OFF_FCB + HID, :]
    bfc = w_ref[OFF_BFC:OFF_BFC + 1, :]
    res = (jnp.dot(h, wfc_f, preferred_element_type=jnp.float32)
           + jnp.dot(h_b, wfc_b, preferred_element_type=jnp.float32)
           + bfc)                                                # (B, 128)
    out_ref[...] = res[:, :TAG_SIZE].astype(out_ref.dtype)


# --------------------------- one-time weight prep ----------------------------
def pack_params(p):
    """Fold the embedding table into the input->hidden weights and pack every
    weight/bias operand into one contiguous f32 slab (done ONCE, off the
    per-call path)."""
    f32 = jnp.float32
    emb_pad = jnp.zeros((VPAD, EMB), f32).at[:VOCAB_SIZE].set(
        p["embedding"].astype(f32))
    w_f = jnp.dot(emb_pad, p["wih_f"].T)                         # (VPAD, 4H)
    w_b = jnp.dot(emb_pad, p["wih_b"].T)                         # (VPAD, 4H)
    whh = p["whh_f"].T                                           # (H, 4H)
    b_f = p["bih_f"] + p["bhh_f"]                                # (4H,)
    b_b = p["bih_b"] + p["bhh_b"]                                # (4H,)
    wfc_f = p["wfc"][:, :HID].T                                  # (H, TAG)
    wfc_b = p["wfc"][:, HID:].T                                  # (H, TAG)
    bfc = p["bfc"]                                               # (TAG,)

    packed = jnp.zeros((PACK_ROWS, PACK_COLS), f32)
    packed = packed.at[OFF_WF:OFF_WF + VPAD, :].set(w_f)
    packed = packed.at[OFF_WB:OFF_WB + VPAD, :].set(w_b)
    packed = packed.at[OFF_WHH:OFF_WHH + HID, :].set(whh)
    packed = packed.at[OFF_BF, :].set(b_f)
    packed = packed.at[OFF_BB, :].set(b_b)
    packed = packed.at[OFF_FCF:OFF_FCF + HID, :TAG_SIZE].set(wfc_f)
    packed = packed.at[OFF_FCB:OFF_FCB + HID, :TAG_SIZE].set(wfc_b)
    packed = packed.at[OFF_BFC, :TAG_SIZE].set(bfc)
    return packed


# ------------------------------ per-call wrapper -----------------------------
@jax.jit
def lstm_pallas(tokens, packed):
    # Only per-call glue: flatten tokens to time-major (row = t*B + b) so the
    # kernel's per-step slice is a contiguous sublane pair.
    tok_tm = tokens.T.reshape(SEQ * BATCH, 1).astype(jnp.int32)

    full = lambda shape: pl.BlockSpec(shape, lambda i, _n=len(shape): (0,) * _n)

    return pl.pallas_call(
        lstm_fc_kernel,
        out_shape=jax.ShapeDtypeStruct((BATCH, TAG_SIZE), jnp.float32),
        grid=(1,),
        in_specs=[
            full((SEQ * BATCH, 1)),
            full((PACK_ROWS, PACK_COLS)),
        ],
        out_specs=full((BATCH, TAG_SIZE)),
        compiler_params=pltpu.CompilerParams(dimension_semantics=("arbitrary",)),
    )(tok_tm, packed)


# ------------------------ pure-JAX reference (for check) --------------------
def lstm_ref(tokens, p):
    emb = jnp.take(p["embedding"], tokens, axis=0)
    x = jnp.transpose(emb, (1, 0, 2)).astype(jnp.float32)        # (S, B, EMB)
    h0 = jnp.zeros((tokens.shape[0], HID), jnp.float32)
    c0 = jnp.zeros((tokens.shape[0], HID), jnp.float32)

    def make_step(wih, whh, bih, bhh):
        def step(carry, x_t):
            h, c = carry
            z = x_t @ wih.T + bih + h @ whh.T + bhh
            i, f, g, o = jnp.split(z, 4, axis=-1)
            i, f, o = jax.nn.sigmoid(i), jax.nn.sigmoid(f), jax.nn.sigmoid(o)
            g = jnp.tanh(g)
            c = f * c + i * g
            h = o * jnp.tanh(c)
            return (h, c), h
        return step

    _, out_f = lax.scan(make_step(p["wih_f"], p["whh_f"], p["bih_f"], p["bhh_f"]),
                        (h0, c0), x)
    _, out_b_rev = lax.scan(make_step(p["wih_b"], p["whh_b"], p["bih_b"], p["bhh_b"]),
                            (h0, c0), x[::-1])
    out = jnp.concatenate([out_f, out_b_rev[::-1]], axis=-1)     # (S, B, 2H)
    last = out[-1]                                               # (B, 2H)
    return last @ p["wfc"].T + p["bfc"]


# ------------------------------- main ----------------------------------------
def init_params(key):
    ks = jax.random.split(key, 12)
    k = 1.0 / jnp.sqrt(HID)
    u = lambda kk, shape: jax.random.uniform(kk, shape, jnp.float32, -k, k)
    return {
        "embedding": jax.random.normal(ks[0], (VOCAB_SIZE, EMB), jnp.float32),
        "wih_f": u(ks[1], (4 * HID, EMB)),
        "whh_f": u(ks[2], (4 * HID, HID)),
        "bih_f": u(ks[3], (4 * HID,)),
        "bhh_f": u(ks[4], (4 * HID,)),
        "wih_b": u(ks[5], (4 * HID, EMB)),
        "whh_b": u(ks[6], (4 * HID, HID)),
        "bih_b": u(ks[7], (4 * HID,)),
        "bhh_b": u(ks[8], (4 * HID,)),
        "wfc": u(ks[9], (TAG_SIZE, NUM_DIRECTION * HID)),
        "bfc": u(ks[10], (TAG_SIZE,)),
    }


if __name__ == "__main__":
    root = jax.random.PRNGKey(0)
    k_param, k_tok = jax.random.split(root)
    params = init_params(k_param)
    tokens = jax.random.randint(k_tok, (BATCH, SEQ), 0, VOCAB_SIZE, dtype=jnp.int32)

    packed = jax.block_until_ready(pack_params(params))   # one-time weight prep

    out = lstm_pallas(tokens, packed)
    out = jax.block_until_ready(out)

    ref = lstm_ref(tokens, params)
    assert out.shape == (BATCH, TAG_SIZE)
    assert jnp.allclose(out, ref, atol=1e-4, rtol=1e-4), (out, ref)

    print("KERNEL_OK")
</pallas_src>

<mosaic_0001>
module attributes {stable_mosaic.version = 11 : i64} {
  func.func @lstm_fc_kernel(%arg0: i32, %arg1: memref<16x1xi32, #tpu.memory_space<vmem>>, %arg2: memref<376x128xf32, #tpu.memory_space<vmem>>, %arg3: memref<2x4xf32, #tpu.memory_space<vmem>>) attributes {dimension_semantics = [#tpu.dimension_semantics<arbitrary>], iteration_bounds = array<i64: 1>, scalar_prefetch = 0 : i64, scratch_operands = 0 : i64, tpu.core_type = #tpu.core_type<tc>, window_params = [{pipeline_mode = #tpu.pipeline_mode<synchronous>, transform_indices = @transform_0, window_bounds = array<i64: 16, 1>}, {pipeline_mode = #tpu.pipeline_mode<synchronous>, transform_indices = @transform_1, window_bounds = array<i64: 376, 128>}, {pipeline_mode = #tpu.pipeline_mode<synchronous>, transform_indices = @transform_2, window_bounds = array<i64: 2, 4>}]} {
    %c0 = arith.constant 0 : index
    %c0_0 = arith.constant 0 : index
    %0 = vector.load %arg1[%c0, %c0_0] : memref<16x1xi32, #tpu.memory_space<vmem>>, vector<16x1xi32>
    %1 = tpu.iota {dimensions = array<i32: 1>} : vector<16x128xi32>
    %2 = vector.broadcast %0 : vector<16x1xi32> to vector<16x128xi32>
    %3 = arith.cmpi eq, %1, %2 : vector<16x128xi32>
    %4 = arith.extui %3 : vector<16x128xi1> to vector<16x128xi32>
    %5 = arith.sitofp %4 : vector<16x128xi32> to vector<16x128xf32>
    %c0_1 = arith.constant 0 : index
    %c0_2 = arith.constant 0 : index
    %6 = vector.load %arg2[%c0_1, %c0_2] : memref<376x128xf32, #tpu.memory_space<vmem>>, vector<128x128xf32>
    %c288 = arith.constant 288 : index
    %c0_3 = arith.constant 0 : index
    %7 = vector.load %arg2[%c288, %c0_3] : memref<376x128xf32, #tpu.memory_space<vmem>>, vector<1x128xf32>
    %cst = arith.constant dense<0.000000e+00> : vector<16x128xf32>
    %8 = tpu.matmul %5, %6, %cst {dimension_numbers = #tpu.dot_dimension_numbers<[1], [0], [0], [1], [0, 0, 1, 1], [], []>} : vector<16x128xf32>, vector<128x128xf32>, vector<16x128xf32> -> vector<16x128xf32>
    %9 = vector.broadcast %7 : vector<1x128xf32> to vector<16x128xf32>
    %10 = arith.addf %8, %9 : vector<16x128xf32>
    %c256 = arith.constant 256 : index
    %c0_4 = arith.constant 0 : index
    %11 = vector.load %arg2[%c256, %c0_4] : memref<376x128xf32, #tpu.memory_space<vmem>>, vector<32x128xf32>
    %cst_5 = arith.constant 0.000000e+00 : f32
    %12 = vector.broadcast %cst_5 : f32 to vector<2x32xf32>
    %cst_6 = arith.constant 0.000000e+00 : f32
    %13 = vector.broadcast %cst_6 : f32 to vector<2x32xf32>
    %14 = vector.extract_strided_slice %10 {offsets = [0, 0], sizes = [2, 128], strides = [1, 1]} : vector<16x128xf32> to vector<2x128xf32>
    %cst_7 = arith.constant dense<0.000000e+00> : vector<2x128xf32>
    %15 = tpu.matmul %12, %11, %cst_7 {dimension_numbers = #tpu.dot_dimension_numbers<[1], [0], [0], [1], [0, 0, 1, 1], [], []>} : vector<2x32xf32>, vector<32x128xf32>, vector<2x128xf32> -> vector<2x128xf32>
    %16 = arith.addf %14, %15 : vector<2x128xf32>
    %17 = arith.negf %16 : vector<2x128xf32>
    %18 = math.exp %17 : vector<2x128xf32>
    %cst_8 = arith.constant 1.000000e+00 : f32
    %19 = vector.broadcast %cst_8 : f32 to vector<2x128xf32>
    %20 = arith.addf %19, %18 : vector<2x128xf32>
    %21 = arith.divf %19, %20 : vector<2x128xf32>
    %22 = vector.extract_strided_slice %16 {offsets = [0, 64], sizes = [2, 32], strides = [1, 1]} : vector<2x128xf32> to vector<2x32xf32>
    %23 = math.tanh %22 : vector<2x32xf32>
    %24 = vector.extract_strided_slice %21 {offsets = [0, 0], sizes = [2, 32], strides = [1, 1]} : vector<2x128xf32> to vector<2x32xf32>
    %25 = vector.extract_strided_slice %21 {offsets = [0, 32], sizes = [2, 32], strides = [1, 1]} : vector<2x128xf32> to vector<2x32xf32>
    %26 = vector.extract_strided_slice %21 {offsets = [0, 96], sizes = [2, 32], strides = [1, 1]} : vector<2x128xf32> to vector<2x32xf32>
    %27 = arith.mulf %25, %13 : vector<2x32xf32>
    %28 = arith.mulf %24, %23 : vector<2x32xf32>
    %29 = arith.addf %27, %28 : vector<2x32xf32>
    %30 = math.tanh %29 : vector<2x32xf32>
    %31 = arith.mulf %26, %30 : vector<2x32xf32>
    %32 = vector.extract_strided_slice %10 {offsets = [2, 0], sizes = [2, 128], strides = [1, 1]} : vector<16x128xf32> to vector<2x128xf32>
    %cst_9 = arith.constant dense<0.000000e+00> : vector<2x128xf32>
    %33 = tpu.matmul %31, %11, %cst_9 {dimension_numbers = #tpu.dot_dimension_numbers<[1], [0], [0], [1], [0, 0, 1, 1], [], []>} : vector<2x32xf32>, vector<32x128xf32>, vector<2x128xf32> -> vector<2x128xf32>
    %34 = arith.addf %32, %33 : vector<2x128xf32>
    %35 = arith.negf %34 : vector<2x128xf32>
    %36 = math.exp %35 : vector<2x128xf32>
    %cst_10 = arith.constant 1.000000e+00 : f32
    %37 = vector.broadcast %cst_10 : f32 to vector<2x128xf32>
    %38 = arith.addf %37, %36 : vector<2x128xf32>
    %39 = arith.divf %37, %38 : vector<2x128xf32>
    %40 = vector.extract_strided_slice %34 {offsets = [0, 64], sizes = [2, 32], strides = [1, 1]} : vector<2x128xf32> to vector<2x32xf32>
    %41 = math.tanh %40 : vector<2x32xf32>
    %42 = vector.extract_strided_slice %39 {offsets = [0, 0], sizes = [2, 32], strides = [1, 1]} : vector<2x128xf32> to vector<2x32xf32>
    %43 = vector.extract_strided_slice %39 {offsets = [0, 32], sizes = [2, 32], strides = [1, 1]} : vector<2x128xf32> to vector<2x32xf32>
    %44 = vector.extract_strided_slice %39 {offsets = [0, 96], sizes = [2, 32], strides = [1, 1]} : vector<2x128xf32> to vector<2x32xf32>
    %45 = arith.mulf %43, %29 : vector<2x32xf32>
    %46 = arith.mulf %42, %41 : vector<2x32xf32>
    %47 = arith.addf %45, %46 : vector<2x32xf32>
    %48 = math.tanh %47 : vector<2x32xf32>
    %49 = arith.mulf %44, %48 : vector<2x32xf32>
    %50 = vector.extract_strided_slice %10 {offsets = [4, 0], sizes = [2, 128], strides = [1, 1]} : vector<16x128xf32> to vector<2x128xf32>
    %cst_11 = arith.constant dense<0.000000e+00> : vector<2x128xf32>
    %51 = tpu.matmul %49, %11, %cst_11 {dimension_numbers = #tpu.dot_dimension_numbers<[1], [0], [0], [1], [0, 0, 1, 1], [], []>} : vector<2x32xf32>, vector<32x128xf32>, vector<2x128xf32> -> vector<2x128xf32>
    %52 = arith.addf %50, %51 : vector<2x128xf32>
    %53 = arith.negf %52 : vector<2x128xf32>
    %54 = math.exp %53 : vector<2x128xf32>
    %cst_12 = arith.constant 1.000000e+00 : f32
    %55 = vector.broadcast %cst_12 : f32 to vector<2x128xf32>
    %56 = arith.addf %55, %54 : vector<2x128xf32>
    %57 = arith.divf %55, %56 : vector<2x128xf32>
    %58 = vector.extract_strided_slice %52 {offsets = [0, 64], sizes = [2, 32], strides = [1, 1]} : vector<2x128xf32> to vector<2x32xf32>
    %59 = math.tanh %58 : vector<2x32xf32>
    %60 = vector.extract_strided_slice %57 {offsets = [0, 0], sizes = [2, 32], strides = [1, 1]} : vector<2x128xf32> to vector<2x32xf32>
    %61 = vector.extract_strided_slice %57 {offsets = [0, 32], sizes = [2, 32], strides = [1, 1]} : vector<2x128xf32> to vector<2x32xf32>
    %62 = vector.extract_strided_slice %57 {offsets = [0, 96], sizes = [2, 32], strides = [1, 1]} : vector<2x128xf32> to vector<2x32xf32>
    %63 = arith.mulf %61, %47 : vector<2x32xf32>
    %64 = arith.mulf %60, %59 : vector<2x32xf32>
    %65 = arith.addf %63, %64 : vector<2x32xf32>
    %66 = math.tanh %65 : vector<2x32xf32>
    %67 = arith.mulf %62, %66 : vector<2x32xf32>
    %68 = vector.extract_strided_slice %10 {offsets = [6, 0], sizes = [2, 128], strides = [1, 1]} : vector<16x128xf32> to vector<2x128xf32>
    %cst_13 = arith.constant dense<0.000000e+00> : vector<2x128xf32>
    %69 = tpu.matmul %67, %11, %cst_13 {dimension_numbers = #tpu.dot_dimension_numbers<[1], [0], [0], [1], [0, 0, 1, 1], [], []>} : vector<2x32xf32>, vector<32x128xf32>, vector<2x128xf32> -> vector<2x128xf32>
    %70 = arith.addf %68, %69 : vector<2x128xf32>
    %71 = arith.negf %70 : vector<2x128xf32>
    %72 = math.exp %71 : vector<2x128xf32>
    %cst_14 = arith.constant 1.000000e+00 : f32
    %73 = vector.broadcast %cst_14 : f32 to vector<2x128xf32>
    %74 = arith.addf %73, %72 : vector<2x128xf32>
    %75 = arith.divf %73, %74 : vector<2x128xf32>
    %76 = vector.extract_strided_slice %70 {offsets = [0, 64], sizes = [2, 32], strides = [1, 1]} : vector<2x128xf32> to vector<2x32xf32>
    %77 = math.tanh %76 : vector<2x32xf32>
    %78 = vector.extract_strided_slice %75 {offsets = [0, 0], sizes = [2, 32], strides = [1, 1]} : vector<2x128xf32> to vector<2x32xf32>
    %79 = vector.extract_strided_slice %75 {offsets = [0, 32], sizes = [2, 32], strides = [1, 1]} : vector<2x128xf32> to vector<2x32xf32>
    %80 = vector.extract_strided_slice %75 {offsets = [0, 96], sizes = [2, 32], strides = [1, 1]} : vector<2x128xf32> to vector<2x32xf32>
    %81 = arith.mulf %79, %65 : vector<2x32xf32>
    %82 = arith.mulf %78, %77 : vector<2x32xf32>
    %83 = arith.addf %81, %82 : vector<2x32xf32>
    %84 = math.tanh %83 : vector<2x32xf32>
    %85 = arith.mulf %80, %84 : vector<2x32xf32>
    %86 = vector.extract_strided_slice %10 {offsets = [8, 0], sizes = [2, 128], strides = [1, 1]} : vector<16x128xf32> to vector<2x128xf32>
    %cst_15 = arith.constant dense<0.000000e+00> : vector<2x128xf32>
    %87 = tpu.matmul %85, %11, %cst_15 {dimension_numbers = #tpu.dot_dimension_numbers<[1], [0], [0], [1], [0, 0, 1, 1], [], []>} : vector<2x32xf32>, vector<32x128xf32>, vector<2x128xf32> -> vector<2x128xf32>
    %88 = arith.addf %86, %87 : vector<2x128xf32>
    %89 = arith.negf %88 : vector<2x128xf32>
    %90 = math.exp %89 : vector<2x128xf32>
    %cst_16 = arith.constant 1.000000e+00 : f32
    %91 = vector.broadcast %cst_16 : f32 to vector<2x128xf32>
    %92 = arith.addf %91, %90 : vector<2x128xf32>
    %93 = arith.divf %91, %92 : vector<2x128xf32>
    %94 = vector.extract_strided_slice %88 {offsets = [0, 64], sizes = [2, 32], strides = [1, 1]} : vector<2x128xf32> to vector<2x32xf32>
    %95 = math.tanh %94 : vector<2x32xf32>
    %96 = vector.extract_strided_slice %93 {offsets = [0, 0], sizes = [2, 32], strides = [1, 1]} : vector<2x128xf32> to vector<2x32xf32>
    %97 = vector.extract_strided_slice %93 {offsets = [0, 32], sizes = [2, 32], strides = [1, 1]} : vector<2x128xf32> to vector<2x32xf32>
    %98 = vector.extract_strided_slice %93 {offsets = [0, 96], sizes = [2, 32], strides = [1, 1]} : vector<2x128xf32> to vector<2x32xf32>
    %99 = arith.mulf %97, %83 : vector<2x32xf32>
    %100 = arith.mulf %96, %95 : vector<2x32xf32>
    %101 = arith.addf %99, %100 : vector<2x32xf32>
    %102 = math.tanh %101 : vector<2x32xf32>
    %103 = arith.mulf %98, %102 : vector<2x32xf32>
    %104 = vector.extract_strided_slice %10 {offsets = [10, 0], sizes = [2, 128], strides = [1, 1]} : vector<16x128xf32> to vector<2x128xf32>
    %cst_17 = arith.constant dense<0.000000e+00> : vector<2x128xf32>
    %105 = tpu.matmul %103, %11, %cst_17 {dimension_numbers = #tpu.dot_dimension_numbers<[1], [0], [0], [1], [0, 0, 1, 1], [], []>} : vector<2x32xf32>, vector<32x128xf32>, vector<2x128xf32> -> vector<2x128xf32>
    %106 = arith.addf %104, %105 : vector<2x128xf32>
    %107 = arith.negf %106 : vector<2x128xf32>
    %108 = math.exp %107 : vector<2x128xf32>
    %cst_18 = arith.constant 1.000000e+00 : f32
    %109 = vector.broadcast %cst_18 : f32 to vector<2x128xf32>
    %110 = arith.addf %109, %108 : vector<2x128xf32>
    %111 = arith.divf %109, %110 : vector<2x128xf32>
    %112 = vector.extract_strided_slice %106 {offsets = [0, 64], sizes = [2, 32], strides = [1, 1]} : vector<2x128xf32> to vector<2x32xf32>
    %113 = math.tanh %112 : vector<2x32xf32>
    %114 = vector.extract_strided_slice %111 {offsets = [0, 0], sizes = [2, 32], strides = [1, 1]} : vector<2x128xf32> to vector<2x32xf32>
    %115 = vector.extract_strided_slice %111 {offsets = [0, 32], sizes = [2, 32], strides = [1, 1]} : vector<2x128xf32> to vector<2x32xf32>
    %116 = vector.extract_strided_slice %111 {offsets = [0, 96], sizes = [2, 32], strides = [1, 1]} : vector<2x128xf32> to vector<2x32xf32>
    %117 = arith.mulf %115, %101 : vector<2x32xf32>
    %118 = arith.mulf %114, %113 : vector<2x32xf32>
    %119 = arith.addf %117, %118 : vector<2x32xf32>
    %120 = math.tanh %119 : vector<2x32xf32>
    %121 = arith.mulf %116, %120 : vector<2x32xf32>
    %122 = vector.extract_strided_slice %10 {offsets = [12, 0], sizes = [2, 128], strides = [1, 1]} : vector<16x128xf32> to vector<2x128xf32>
    %cst_19 = arith.constant dense<0.000000e+00> : vector<2x128xf32>
    %123 = tpu.matmul %121, %11, %cst_19 {dimension_numbers = #tpu.dot_dimension_numbers<[1], [0], [0], [1], [0, 0, 1, 1], [], []>} : vector<2x32xf32>, vector<32x128xf32>, vector<2x128xf32> -> vector<2x128xf32>
    %124 = arith.addf %122, %123 : vector<2x128xf32>
    %125 = arith.negf %124 : vector<2x128xf32>
    %126 = math.exp %125 : vector<2x128xf32>
    %cst_20 = arith.constant 1.000000e+00 : f32
    %127 = vector.broadcast %cst_20 : f32 to vector<2x128xf32>
    %128 = arith.addf %127, %126 : vector<2x128xf32>
    %129 = arith.divf %127, %128 : vector<2x128xf32>
    %130 = vector.extract_strided_slice %124 {offsets = [0, 64], sizes = [2, 32], strides = [1, 1]} : vector<2x128xf32> to vector<2x32xf32>
    %131 = math.tanh %130 : vector<2x32xf32>
    %132 = vector.extract_strided_slice %129 {offsets = [0, 0], sizes = [2, 32], strides = [1, 1]} : vector<2x128xf32> to vector<2x32xf32>
    %133 = vector.extract_strided_slice %129 {offsets = [0, 32], sizes = [2, 32], strides = [1, 1]} : vector<2x128xf32> to vector<2x32xf32>
    %134 = vector.extract_strided_slice %129 {offsets = [0, 96], sizes = [2, 32], strides = [1, 1]} : vector<2x128xf32> to vector<2x32xf32>
    %135 = arith.mulf %133, %119 : vector<2x32xf32>
    %136 = arith.mulf %132, %131 : vector<2x32xf32>
    %137 = arith.addf %135, %136 : vector<2x32xf32>
    %138 = math.tanh %137 : vector<2x32xf32>
    %139 = arith.mulf %134, %138 : vector<2x32xf32>
    %140 = vector.extract_strided_slice %10 {offsets = [14, 0], sizes = [2, 128], strides = [1, 1]} : vector<16x128xf32> to vector<2x128xf32>
    %cst_21 = arith.constant dense<0.000000e+00> : vector<2x128xf32>
    %141 = tpu.matmul %139, %11, %cst_21 {dimension_numbers = #tpu.dot_dimension_numbers<[1], [0], [0], [1], [0, 0, 1, 1], [], []>} : vector<2x32xf32>, vector<32x128xf32>, vector<2x128xf32> -> vector<2x128xf32>
    %142 = arith.addf %140, %141 : vector<2x128xf32>
    %143 = arith.negf %142 : vector<2x128xf32>
    %144 = math.exp %143 : vector<2x128xf32>
    %cst_22 = arith.constant 1.000000e+00 : f32
    %145 = vector.broadcast %cst_22 : f32 to vector<2x128xf32>
    %146 = arith.addf %145, %144 : vector<2x128xf32>
    %147 = arith.divf %145, %146 : vector<2x128xf32>
    %148 = vector.extract_strided_slice %142 {offsets = [0, 64], sizes = [2, 32], strides = [1, 1]} : vector<2x128xf32> to vector<2x32xf32>
    %149 = math.tanh %148 : vector<2x32xf32>
    %150 = vector.extract_strided_slice %147 {offsets = [0, 0], sizes = [2, 32], strides = [1, 1]} : vector<2x128xf32> to vector<2x32xf32>
    %151 = vector.extract_strided_slice %147 {offsets = [0, 32], sizes = [2, 32], strides = [1, 1]} : vector<2x128xf32> to vector<2x32xf32>
    %152 = vector.extract_strided_slice %147 {offsets = [0, 96], sizes = [2, 32], strides = [1, 1]} : vector<2x128xf32> to vector<2x32xf32>
    %153 = arith.mulf %151, %137 : vector<2x32xf32>
    %154 = arith.mulf %150, %149 : vector<2x32xf32>
    %155 = arith.addf %153, %154 : vector<2x32xf32>
    %156 = math.tanh %155 : vector<2x32xf32>
    %157 = arith.mulf %152, %156 : vector<2x32xf32>
    %c128 = arith.constant 128 : index
    %c0_23 = arith.constant 0 : index
    %158 = vector.load %arg2[%c128, %c0_23] : memref<376x128xf32, #tpu.memory_space<vmem>>, vector<128x128xf32>
    %c296 = arith.constant 296 : index
    %c0_24 = arith.constant 0 : index
    %159 = vector.load %arg2[%c296, %c0_24] : memref<376x128xf32, #tpu.memory_space<vmem>>, vector<1x128xf32>
    %160 = vector.extract_strided_slice %5 {offsets = [14, 0], sizes = [2, 128], strides = [1, 1]} : vector<16x128xf32> to vector<2x128xf32>
    %cst_25 = arith.constant dense<0.000000e+00> : vector<2x128xf32>
    %161 = tpu.matmul %160, %158, %cst_25 {dimension_numbers = #tpu.dot_dimension_numbers<[1], [0], [0], [1], [0, 0, 1, 1], [], []>} : vector<2x128xf32>, vector<128x128xf32>, vector<2x128xf32> -> vector<2x128xf32>
    %162 = vector.broadcast %159 : vector<1x128xf32> to vector<2x128xf32>
    %163 = arith.addf %161, %162 : vector<2x128xf32>
    %164 = arith.negf %163 : vector<2x128xf32>
    %165 = math.exp %164 : vector<2x128xf32>
    %cst_26 = arith.constant 1.000000e+00 : f32
    %166 = vector.broadcast %cst_26 : f32 to vector<2x128xf32>
    %167 = arith.addf %166, %165 : vector<2x128xf32>
    %168 = arith.divf %166, %167 : vector<2x128xf32>
    %169 = vector.extract_strided_slice %163 {offsets = [0, 64], sizes = [2, 32], strides = [1, 1]} : vector<2x128xf32> to vector<2x32xf32>
    %170 = math.tanh %169 : vector<2x32xf32>
    %171 = vector.extract_strided_slice %168 {offsets = [0, 0], sizes = [2, 32], strides = [1, 1]} : vector<2x128xf32> to vector<2x32xf32>
    %172 = vector.extract_strided_slice %168 {offsets = [0, 96], sizes = [2, 32], strides = [1, 1]} : vector<2x128xf32> to vector<2x32xf32>
    %173 = arith.mulf %171, %170 : vector<2x32xf32>
    %174 = math.tanh %173 : vector<2x32xf32>
    %175 = arith.mulf %172, %174 : vector<2x32xf32>
    %c304 = arith.constant 304 : index
    %c0_27 = arith.constant 0 : index
    %176 = vector.load %arg2[%c304, %c0_27] : memref<376x128xf32, #tpu.memory_space<vmem>>, vector<32x128xf32>
    %c336 = arith.constant 336 : index
    %c0_28 = arith.constant 0 : index
    %177 = vector.load %arg2[%c336, %c0_28] : memref<376x128xf32, #tpu.memory_space<vmem>>, vector<32x128xf32>
    %c368 = arith.constant 368 : index
    %c0_29 = arith.constant 0 : index
    %178 = vector.load %arg2[%c368, %c0_29] : memref<376x128xf32, #tpu.memory_space<vmem>>, vector<1x128xf32>
    %cst_30 = arith.constant dense<0.000000e+00> : vector<2x128xf32>
    %179 = tpu.matmul %157, %176, %cst_30 {dimension_numbers = #tpu.dot_dimension_numbers<[1], [0], [0], [1], [0, 0, 1, 1], [], []>} : vector<2x32xf32>, vector<32x128xf32>, vector<2x128xf32> -> vector<2x128xf32>
    %cst_31 = arith.constant dense<0.000000e+00> : vector<2x128xf32>
    %180 = tpu.matmul %175, %177, %cst_31 {dimension_numbers = #tpu.dot_dimension_numbers<[1], [0], [0], [1], [0, 0, 1, 1], [], []>} : vector<2x32xf32>, vector<32x128xf32>, vector<2x128xf32> -> vector<2x128xf32>
    %181 = arith.addf %179, %180 : vector<2x128xf32>
    %182 = vector.broadcast %178 : vector<1x128xf32> to vector<2x128xf32>
    %183 = arith.addf %181, %182 : vector<2x128xf32>
    %184 = vector.extract_strided_slice %183 {offsets = [0, 0], sizes = [2, 4], strides = [1, 1]} : vector<2x128xf32> to vector<2x4xf32>
    %c0_32 = arith.constant 0 : index
    %c0_33 = arith.constant 0 : index
    %185 = vector.load %arg3[%c0_32, %c0_33] : memref<2x4xf32, #tpu.memory_space<vmem>>, vector<2x4xf32>
    tpu.vector_store %arg3[%c0_32, %c0_33], %184 {strides = array<i32>} : memref<2x4xf32, #tpu.memory_space<vmem>>, vector<2x4xf32>,
    return
  }
  func.func @transform_0(%arg0: i32) -> (i32, i32) {
    %c0_i32 = arith.constant 0 : i32
    %c0_i32_0 = arith.constant 0 : i32
    %c0_i32_1 = arith.constant 0 : i32
    return %c0_i32, %c0_i32_0 : i32, i32
  }
  func.func @transform_1(%arg0: i32) -> (i32, i32) {
    %c0_i32 = arith.constant 0 : i32
    %c0_i32_0 = arith.constant 0 : i32
    %c0_i32_1 = arith.constant 0 : i32
    return %c0_i32, %c0_i32_0 : i32, i32
  }
  func.func @transform_2(%arg0: i32) -> (i32, i32) {
    %c0_i32 = arith.constant 0 : i32
    %c0_i32_0 = arith.constant 0 : i32
    %c0_i32_1 = arith.constant 0 : i32
    return %c0_i32, %c0_i32_0 : i32, i32
  }
}

</mosaic_0001>

<bundles_post_ra>
// kernel: lstm_pallas.1
= control target key start
LH: loop header
LB: loop body
LE: loop exit
PB: predicated region body
PF: predicated region fallthrough
CT: control target
= control target key end

     0   :  { %7 = vsyncpa [#allocation3], 0  ;;  %s1931_s0 = inlined_call_operand.vmem [shape: s32[16,1], index: 0, kind: input, shape index: {}]   ;;  %s1932_s1 = inlined_call_operand.hbm [shape: f32[376,128], index: 1, kind: input, shape index: {}]   ;;  %s1933_s2 = inlined_call_operand.hbm [shape: f32[2,4], index: 2, kind: output, shape index: {}]  }
   0x1   :  { %8 = vsyncpa [#allocation4], 0  ;;  %s1697_s9 = smov [#allocation2]  }
   0x2   :  { %s16_s10 = sshll.u32 %s1697_s9, 4  ;;  %s17_s10 = int_to_ptr.vmem [resolvable:$true] %s16_s10 }
   0x3   :  { %s1661_s11 = scalar_lea.vmem %s17_s10, 6016  ;;  %p1666_p1 = scmp.lt.s32.totalorder %s17_s10, %s17_s10 }
   0x4   :  { %p1662_p0 = scmp.ne.s32.totalorder %s17_s10, %s1661_s11  ;;  %p1667_p2 = scmp.lt.s32.totalorder %s1661_s11, %s1661_s11 }
   0x6   :  { %p1668_p3 = por %p1667_p2, %p1666_p1 }
   0x8   :  { %p1669_p4 = pnand %p1668_p3, %p1662_p0 }
   0xa   :  { %1672 = shalt.err (!%p1669_p4)
}
   0xb   :  { %s1698_s12 = smov 128   ;;  %s1699_s13 = smov 8  }
   0xc   :  { %22 = dma.hbm_to_vmem [thread:$0]  %s1932_s1, 6016, %s17_s10, [#allocation3], %s1698_s12, %s1698_s12, %s1699_s13  }
   0xd   :  { %1693 = dma.done.wait [#allocation3], 6016  }
   0xe   :  { %1694 = vsyncadd [#allocation3], 4294961280  ;;  %v1700_v0 = vmov 0   ;;  %v1701_v1 = vmov 0.0   ;;  %v26_v2 = vld [vmem:[%s1931_s0] sm:$0xff]  ;;  %v57_v3 = vld [vmem:[#allocation2 + $0x78] sm:$0xff]  ;;  %v28_v24 = vlaneseq }
   0xf   :  { %1580 = vset.pattern.permute.xlu0 %v1700_v0  ;;  %1424 = vmatprep.subr.mxu1 %v1701_v1  ;;  %v56_v4 = vld [vmem:[#allocation2 + $0x70] sm:$0xff]  ;;  %v27_v5 = vld [vmem:[%s1931_s0 + $0x8] sm:$0xff]  ;;  %vm1702_vm0 = vmmov 0   ;;  %v54_v7 = vld [vmem:[#allocation2 + $0x60] sm:$0xff]  ;;  %v1703_v27 = vmov 1.0   ;;  %s1704_s0 = smov 64  }
  0x10   :  { %31 = vperm.xlu0 %1580, %v26_v2   ;;  %1389 = vmatprep.subr.mxu0 %v57_v3  ;;  %v55_v6 = vld [vmem:[#allocation2 + $0x68] sm:$0xff]  ;;  %v1735_v8 = vld [vmem:[#allocation2 + $0x118] sm:$0xff]  ;;  %v1738_v10 = vld [vmem:[#allocation2 + $0x110] sm:$0xff]  ;;  %v1763_v25 = vand.u32 127, %v28_v24  ;;  %s1705_s1 = smov 32   ;;  %vm142_vm3 = vcmask 261120  }
  0x11   :  { %1390 = vmatpush3.msra.mxu0 %v57_v3  ;;  %1432 = vmatprep.mubr.msk.f32.mxu1 %vm1702_vm0, %v1701_v1  ;;  %v53_v9 = vld [vmem:[#allocation2 + $0x58] sm:$0xff]  ;;  %v1741_v11 = vld [vmem:[#allocation2 + $0x108] sm:$0xff]  ;;  %v52_v12 = vld [vmem:[#allocation2 + $0x50] sm:$0xff]  ;;  %s1706_s20 = smov 96   ;;  %s1707_s21 = smov [#allocation5]   ;;  %vm1262_vm4 = vcmask 25600  }
  0x12   :  { %1391 = vmatprep.subr.mxu0 %v56_v4  ;;  %1425 = vmatpush3.msra.mxu1 %v1735_v8  ;;  %v1745_v13 = vld [vmem:[#allocation2 + $0x100] sm:$0xff]  ;;  %v51_v14 = vld [vmem:[#allocation2 + $0x48] sm:$0xff]  ;;  %v49_v16 = vld [vmem:[#allocation2 + $0x38] sm:$0xff]  ;;  %s1270_s22 = sshll.u32 %s1707_s21, 4  ;;  %s1271_s22 = int_to_ptr.vmem [resolvable:$true] %s1270_s22 }
  0x13   :  { %1392 = vmatpush3.msra.mxu0 %v56_v4  ;;  %1426 = vmatprep.subr.mxu1 %v1701_v1  ;;  %v50_v15 = vld [vmem:[#allocation2 + $0x40] sm:$0xff]  ;;  %v48_v17 = vld [vmem:[#allocation2 + $0x30] sm:$0xff]  ;;  %v47_v18 = vld [vmem:[#allocation2 + $0x28] sm:$0xff]  ;;  %s1673_s23 = scalar_lea.vmem %s1271_s22, 32  ;;  %p1678_p6 = scmp.lt.s32.totalorder %s1271_s22, %s1271_s22 }
  0x14   :  { %34 = vperm.xlu0 %1580, %v27_v5   ;;  %1393 = vmatprep.subr.mxu0 %v55_v6  ;;  %v46_v19 = vld [vmem:[#allocation2 + $0x20] sm:$0xff]  ;;  %v45_v20 = vld [vmem:[#allocation2 + $0x18] sm:$0xff]  ;;  %v44_v21 = vld [vmem:[#allocation2 + $0x10] sm:$0xff]  ;;  %p1674_p5 = scmp.ne.s32.totalorder %s1271_s22, %s1673_s23  ;;  %p1679_p7 = scmp.lt.s32.totalorder %s1673_s23, %s1673_s23 }
  0x15   :  { %1394 = vmatpush3.msra.mxu0 %v55_v6  ;;  %1427 = vmatpush3.msra.mxu1 %v1738_v10  ;;  %v43_v22 = vld [vmem:[#allocation2 + $0x8] sm:$0xff]  ;;  %v42_v23 = vld [vmem:[#allocation2] sm:$0xff] }
  0x16   :  { %1395 = vmatprep.subr.mxu0 %v54_v7  ;;  %1428 = vmatprep.subr.mxu1 %v1701_v1  ;;  %v1281_v31 = vld [vmem:[#allocation2 + $0x120] ss:$0 sm:$0xff]  ;;  %p1680_p8 = por %p1679_p7, %p1678_p6 }
  0x17   :  { %1396 = vmatpush3.msra.mxu0 %v54_v7  ;;  %1429 = vmatpush3.msra.mxu1 %v1741_v11 }
  0x18   :  { %1397 = vmatprep.subr.mxu0 %v53_v9  ;;  %1430 = vmatprep.subr.mxu1 %v1701_v1  ;;  %p1681_p9 = pnand %p1680_p8, %p1674_p5 }
  0x19   :  { %1398 = vmatpush3.msra.mxu0 %v53_v9  ;;  %1431 = vmatpush3.msra.mxu1 %v1745_v13 }
  0x1a   :  { %1399 = vmatprep.subr.mxu0 %v52_v12  ;;  %1433 = vmatmul.mubr.f32.vlgmr.msra.gmra.mxu1 %v1701_v1 }
  0x1b   :  { %1400 = vmatpush3.msra.mxu0 %v52_v12  ;;  %1435 = vmatprep.subr.mxu1 %v1701_v1 }
  0x1c   :  { %1401 = vmatprep.subr.mxu0 %v51_v14  ;;  %1436 = vmatpush3.msra.mxu1 %v1735_v8 }
  0x1d   :  { %1402 = vmatpush3.msra.mxu0 %v51_v14  ;;  %1437 = vmatprep.subr.mxu1 %v1701_v1 }
  0x1e   :  { %1403 = vmatprep.subr.mxu0 %v50_v15  ;;  %1438 = vmatpush3.msra.mxu1 %v1738_v10 }
  0x1f   :  { %1404 = vmatpush3.msra.mxu0 %v50_v15  ;;  %1439 = vmatprep.subr.mxu1 %v1701_v1 }
  0x20   :  { %1405 = vmatprep.subr.mxu0 %v49_v16  ;;  %1440 = vmatpush3.msra.mxu1 %v1741_v11 }
  0x21   :  { %1406 = vmatpush3.msra.mxu0 %v49_v16  ;;  %1441 = vmatprep.subr.mxu1 %v1701_v1 }
  0x22   :  { %1407 = vmatprep.subr.mxu0 %v48_v17  ;;  %1442 = vmatpush3.msra.mxu1 %v1745_v13 }
  0x23   :  { %1408 = vmatpush3.msra.mxu0 %v48_v17  ;;  %1443 = vmatprep.mubr.msk.f32.mxu1 %vm1702_vm0, %v1701_v1 }
  0x24   :  { %1409 = vmatprep.subr.mxu0 %v47_v18  ;;  %1446 = vmatprep.subr.mxu1 %v1701_v1 }
  0x25   :  { %1410 = vmatpush3.msra.mxu0 %v47_v18 }
  0x26   :  { %1411 = vmatprep.subr.mxu0 %v46_v19 }
  0x27   :  { %1412 = vmatpush3.msra.mxu0 %v46_v19 }
  0x28   :  { %1413 = vmatprep.subr.mxu0 %v45_v20 }
  0x29   :  { %1414 = vmatpush3.msra.mxu0 %v45_v20 }
  0x2a   :  { %1415 = vmatprep.subr.mxu0 %v44_v21 }
  0x2b   :  { %1416 = vmatpush3.msra.mxu0 %v44_v21 }
  0x2c   :  { %1417 = vmatprep.subr.mxu0 %v43_v22 }
  0x2d   :  { %1418 = vmatpush3.msra.mxu0 %v43_v22 }
  0x2e   :  { %1419 = vmatprep.subr.mxu0 %v42_v23 }
  0x2f   :  { %1420 = vmatpush3.msra.mxu0 %v42_v23 }
  0x30   :  { %1490 = vmatprep.subr.mxu0 %v1701_v1 }
  0x8b   :  { %v32_v26 = vpop.permute.xlu0 %31 }
  0x8c   :  { %vm36_vm1 = vcmp.eq.s32.totalorder %v1763_v25, %v32_v26 }
  0x8d   :  { %1421 = vmatprep.mubr.msk.f32.mxu0 %vm36_vm1, %v1703_v27 }
  0x8f   :  { %v1766_v28 = vpop.permute.xlu0 %34 }
  0x90   :  { %vm37_vm2 = vcmp.eq.s32.totalorder %v1763_v25, %v1766_v28 }
  0x91   :  { %1422 = vmatmul.mubr.msk.f32.vlgmr.msra.gmra.mxu0 %vm37_vm2, %v1703_v27 }
  0x92   :  { %1491 = vmatpush3.msra.mxu0 %v1735_v8  ;;  %1498 = vmatprep.mubr.msk.f32.mxu0 %vm1702_vm0, %v1701_v1 }
  0x93   :  { %1492 = vmatprep.subr.mxu0 %v1701_v1 }
  0x94   :  { %1493 = vmatpush3.msra.mxu0 %v1738_v10 }
  0x95   :  { %1494 = vmatprep.subr.mxu0 %v1701_v1 }
  0x96   :  { %1495 = vmatpush3.msra.mxu0 %v1741_v11 }
  0x97   :  { %1496 = vmatprep.subr.mxu0 %v1701_v1 }
  0x98   :  { %1497 = vmatpush3.msra.mxu0 %v1745_v13 }
  0x99   :  { %1512 = vmatprep.subr.mxu0 %v1701_v1 }
  0xda   :  { %v212_v29 = vpop.f32.mrf.mxu1 }
  0xdc   :  { %v1434_v30 = vpop.f32.mrf.mxu1 }
 0x151   :  { %v1423_v32 = vpop.f32.mrf.mxu0 }
 0x152   :  { %v1783_v33 = vadd.f32 %v1423_v32, %v1281_v31 }
 0x153   :  { %v129_v34 = vpop.f32.mrf.mxu0 }
 0x154   :  { %v1785_v35 = vadd.f32 %v1281_v31, %v129_v34 }
 0x156   :  { %v216_v36 = vadd.f32 %v212_v29, %v1785_v35 }
 0x158   :  { %1581 = vtanh.f32 %v216_v36  ;;  %v1284_v38 = vmul.f32 -1.442695, %v216_v36 }
 0x15a   :  { %1583 = vpow2.f32 %v1284_v38 }
 0x165   :  { %v1582_v37 = vpop.eup %1581 }
 0x166   :  { %226 = vrot.lane.b32.xlu1 %v1582_v37, %s1704_s0 }
 0x167   :  { %v1584_v39 = vpop.eup %1583 }
 0x168   :  { %v220_v40 = vadd.f32 1.0, %v1584_v39 }
 0x16a   :  { %1585 = vrcp.f32 %v220_v40 }
 0x177   :  { %v1586_v41 = vpop.eup %1585 }
 0x178   :  { %v224_v44 = vmul.f32 0.0, %v1586_v41 }
 0x1d8   :  { %v227_v42 = vpop.permute.xlu1 %226 }
 0x1d9   :  { %v229_v43 = vmul.f32 %v1586_v41, %v227_v42 }
 0x1db   :  { %231 = vrot.lane.b32.xlu1 %v229_v43, %s1705_s1 }
 0x24d   :  { %v232_v45 = vpop.permute.xlu1 %231 }
 0x24e   :  { %v234_v46 = vadd.f32 %v232_v45, %v224_v44 }
 0x250   :  { %1587 = vtanh.f32 %v234_v46  ;;  %v328_v62 = vrot.slane %v234_v46, 6 }
 0x25d   :  { %v1588_v47 = vpop.eup %1587 }
 0x25e   :  { %237 = vrot.lane.b32.xlu0 %v1588_v47, %s1704_s0 }
 0x2d0   :  { %v238_v48 = vpop.permute.xlu0 %237 }
 0x2d1   :  { %v240_v49 = vmul.f32 %v1586_v41, %v238_v48 }
 0x2d3   :  { %242 = vrot.lane.b32.xlu1 %v240_v49, %s1705_s1 }
 0x345   :  { %v243_v50 = vpop.permute.xlu1 %242 }
 0x346   :  { %1444 = vmatmul.mubr.msk.f32.vlgmr.msra.gmra.mxu1 %vm142_vm3, %v243_v50 }
 0x347   :  { %1447 = vmatpush3.msra.mxu1 %v1735_v8  ;;  %1454 = vmatprep.mubr.msk.f32.mxu1 %vm1702_vm0, %v1701_v1 }
 0x348   :  { %1448 = vmatprep.subr.mxu1 %v1701_v1 }
 0x349   :  { %1449 = vmatpush3.msra.mxu1 %v1738_v10 }
 0x34a   :  { %1450 = vmatprep.subr.mxu1 %v1701_v1 }
 0x34b   :  { %1451 = vmatpush3.msra.mxu1 %v1741_v11 }
 0x34c   :  { %1452 = vmatprep.subr.mxu1 %v1701_v1 }
 0x34d   :  { %1453 = vmatpush3.msra.mxu1 %v1745_v13 }
 0x34e   :  { %1457 = vmatprep.subr.mxu1 %v1701_v1 }
 0x406   :  { %v312_v51 = vpop.f32.mrf.mxu1 }
 0x407   :  { %v317_v52 = vrot.slane %v312_v51, 6 }
 0x408   :  { %v1445_v53 = vpop.f32.mrf.mxu1 }
 0x409   :  { %v319_v54 = vadd.f32 %v317_v52, %v1785_v35 }
 0x40b   :  { %1589 = vtanh.f32 %v319_v54  ;;  %v1286_v56 = vmul.f32 -1.442695, %v319_v54 }
 0x40d   :  { %1591 = vpow2.f32 %v1286_v56 }
 0x418   :  { %v1590_v55 = vpop.eup %1589 }
 0x419   :  { %332 = vrot.lane.b32.xlu0 %v1590_v55, %s1704_s0 }
 0x41a   :  { %v1592_v57 = vpop.eup %1591 }
 0x41b   :  { %v323_v58 = vadd.f32 1.0, %v1592_v57 }
 0x41d   :  { %1593 = vrcp.f32 %v323_v58 }
 0x42a   :  { %v1594_v59 = vpop.eup %1593 }
 0x42b   :  { %v330_v63 = vmul.f32 %v1594_v59, %v328_v62 }
 0x48b   :  { %v333_v60 = vpop.permute.xlu0 %332 }
 0x48c   :  { %v335_v61 = vmul.f32 %v1594_v59, %v333_v60 }
 0x48e   :  { %337 = vrot.lane.b32.xlu1 %v335_v61, %s1705_s1 }
 0x500   :  { %v338_v0 = vpop.permute.xlu1 %337 }
 0x501   :  { %v340_v2 = vadd.f32 %v338_v0, %v330_v63 }
 0x503   :  { %1595 = vtanh.f32 %v340_v2  ;;  %v435_v23 = vrot.slane %v340_v2, 6 }
 0x510   :  { %v1596_v3 = vpop.eup %1595 }
 0x511   :  { %343 = vrot.lane.b32.xlu0 %v1596_v3, %s1704_s0 }
 0x583   :  { %v344_v4 = vpop.permute.xlu0 %343 }
 0x584   :  { %v346_v5 = vmul.f32 %v1594_v59, %v344_v4 }
 0x586   :  { %v348_v6 = vrot.slane %v346_v5, 2 }
 0x588   :  { %349 = vrot.lane.b32.xlu1 %v348_v6, %s1705_s1 }
 0x5fa   :  { %v350_v7 = vpop.permute.xlu1 %349 }
 0x5fb   :  { %1455 = vmatmul.mubr.msk.f32.vlgmr.msra.gmra.mxu1 %vm142_vm3, %v350_v7 }
 0x5fc   :  { %1458 = vmatpush3.msra.mxu1 %v1735_v8  ;;  %1465 = vmatprep.mubr.msk.f32.mxu1 %vm1702_vm0, %v1701_v1 }
 0x5fd   :  { %1459 = vmatprep.subr.mxu1 %v1701_v1 }
 0x5fe   :  { %1460 = vmatpush3.msra.mxu1 %v1738_v10 }
 0x5ff   :  { %1461 = vmatprep.subr.mxu1 %v1701_v1 }
 0x600   :  { %1462 = vmatpush3.msra.mxu1 %v1741_v11 }
 0x601   :  { %1463 = vmatprep.subr.mxu1 %v1701_v1 }
 0x602   :  { %1464 = vmatpush3.msra.mxu1 %v1745_v13 }
 0x603   :  { %1468 = vmatprep.subr.mxu1 %v1701_v1 }
 0x6bb   :  { %v419_v9 = vpop.f32.mrf.mxu1 }
 0x6bc   :  { %v424_v12 = vrot.slane %v419_v9, 4 }
 0x6bd   :  { %v1456_v14 = vpop.f32.mrf.mxu1 }
 0x6be   :  { %v426_v15 = vadd.f32 %v424_v12, %v1785_v35 }
 0x6c0   :  { %1597 = vtanh.f32 %v426_v15  ;;  %v1288_v17 = vmul.f32 -1.442695, %v426_v15 }
 0x6c2   :  { %1599 = vpow2.f32 %v1288_v17 }
 0x6cd   :  { %v1598_v16 = vpop.eup %1597 }
 0x6ce   :  { %439 = vrot.lane.b32.xlu0 %v1598_v16, %s1704_s0 }
 0x6cf   :  { %v1600_v18 = vpop.eup %1599 }
 0x6d0   :  { %v430_v19 = vadd.f32 1.0, %v1600_v18 }
 0x6d2   :  { %1601 = vrcp.f32 %v430_v19 }
 0x6df   :  { %v1602_v20 = vpop.eup %1601 }
 0x6e0   :  { %v437_v24 = vmul.f32 %v1602_v20, %v435_v23 }
 0x740   :  { %v440_v21 = vpop.permute.xlu0 %439 }
 0x741   :  { %v442_v22 = vmul.f32 %v1602_v20, %v440_v21 }
 0x743   :  { %444 = vrot.lane.b32.xlu1 %v442_v22, %s1705_s1 }
 0x7b5   :  { %v445_v26 = vpop.permute.xlu1 %444 }
 0x7b6   :  { %v447_v27 = vadd.f32 %v445_v26, %v437_v24 }
 0x7b8   :  { %1603 = vtanh.f32 %v447_v27  ;;  %v542_v47 = vrot.slane %v447_v27, 6 }
 0x7c5   :  { %v1604_v29 = vpop.eup %1603 }
 0x7c6   :  { %450 = vrot.lane.b32.xlu0 %v1604_v29, %s1704_s0 }
 0x838   :  { %v451_v30 = vpop.permute.xlu0 %450 }
 0x839   :  { %v453_v31 = vmul.f32 %v1602_v20, %v451_v30 }
 0x83b   :  { %v455_v32 = vrot.slane %v453_v31, 4  ;;  %v1000_v31 = vld [vmem:[#allocation2 + $0xf8] sm:$0xff] }
 0x83d   :  { %456 = vrot.lane.b32.xlu1 %v455_v32, %s1705_s1 }
 0x8af   :  { %v457_v34 = vpop.permute.xlu1 %456 }
 0x8b0   :  { %1466 = vmatmul.mubr.msk.f32.vlgmr.msra.gmra.mxu1 %vm142_vm3, %v457_v34  ;;  %v999_v34 = vld [vmem:[#allocation2 + $0xf0] sm:$0xff] }
 0x8b1   :  { %1469 = vmatpush3.msra.mxu1 %v1735_v8  ;;  %1476 = vmatprep.mubr.msk.f32.mxu1 %vm1702_vm0, %v1701_v1 }
 0x8b2   :  { %1470 = vmatprep.subr.mxu1 %v1701_v1 }
 0x8b3   :  { %1471 = vmatpush3.msra.mxu1 %v1738_v10 }
 0x8b4   :  { %1472 = vmatprep.subr.mxu1 %v1701_v1 }
 0x8b5   :  { %1473 = vmatpush3.msra.mxu1 %v1741_v11 }
 0x8b6   :  { %1474 = vmatprep.subr.mxu1 %v1701_v1 }
 0x8b7   :  { %1475 = vmatpush3.msra.mxu1 %v1745_v13 }
 0x8b8   :  { %1479 = vmatprep.subr.mxu1 %v1701_v1 }
 0x970   :  { %v526_v36 = vpop.f32.mrf.mxu1 }
 0x971   :  { %v531_v37 = vrot.slane %v526_v36, 2  ;;  %v998_v36 = vld [vmem:[#allocation2 + $0xe8] sm:$0xff] }
 0x972   :  { %v1467_v38 = vpop.f32.mrf.mxu1 }
 0x973   :  { %v533_v39 = vadd.f32 %v531_v37, %v1785_v35  ;;  %v997_v37 = vld [vmem:[#allocation2 + $0xe0] sm:$0xff]  ;;  %v996_v38 = vld [vmem:[#allocation2 + $0xd8] sm:$0xff] }
 0x975   :  { %1605 = vtanh.f32 %v533_v39  ;;  %v1290_v41 = vmul.f32 -1.442695, %v533_v39  ;;  %v995_v39 = vld [vmem:[#allocation2 + $0xd0] sm:$0xff] }
 0x977   :  { %1607 = vpow2.f32 %v1290_v41  ;;  %v993_v41 = vld [vmem:[#allocation2 + $0xc0] sm:$0xff] }
 0x982   :  { %v1606_v40 = vpop.eup %1605 }
 0x983   :  { %546 = vrot.lane.b32.xlu0 %v1606_v40, %s1704_s0  ;;  %v994_v40 = vld [vmem:[#allocation2 + $0xc8] sm:$0xff] }
 0x984   :  { %v1608_v42 = vpop.eup %1607 }
 0x985   :  { %v537_v43 = vadd.f32 1.0, %v1608_v42  ;;  %v992_v42 = vld [vmem:[#allocation2 + $0xb8] sm:$0xff] }
 0x987   :  { %1609 = vrcp.f32 %v537_v43  ;;  %v991_v43 = vld [vmem:[#allocation2 + $0xb0] sm:$0xff] }
 0x994   :  { %v1610_v44 = vpop.eup %1609 }
 0x995   :  { %v544_v48 = vmul.f32 %v1610_v44, %v542_v47  ;;  %v987_v47 = vld [vmem:[#allocation2 + $0x90] sm:$0xff] }
 0x9f5   :  { %v547_v45 = vpop.permute.xlu0 %546 }
 0x9f6   :  { %v549_v46 = vmul.f32 %v1610_v44, %v547_v45  ;;  %v989_v45 = vld [vmem:[#allocation2 + $0xa0] sm:$0xff] }
 0x9f8   :  { %551 = vrot.lane.b32.xlu1 %v549_v46, %s1705_s1  ;;  %v988_v46 = vld [vmem:[#allocation2 + $0x98] sm:$0xff] }
 0xa6a   :  { %v552_v49 = vpop.permute.xlu1 %551 }
 0xa6b   :  { %v554_v50 = vadd.f32 %v552_v49, %v544_v48  ;;  %v986_v48 = vld [vmem:[#allocation2 + $0x88] sm:$0xff]  ;;  %v1280_v49 = vsel %vm37_vm2, 1.0, %v1701_v1 }
 0xa6d   :  { %1611 = vtanh.f32 %v554_v50  ;;  %v646_v2 = vrot.slane %v554_v50, 6  ;;  %v985_v50 = vld [vmem:[#allocation2 + $0x80] sm:$0xff] }
 0xa7a   :  { %v1612_v35 = vpop.eup %1611 }
 0xa7b   :  { %557 = vrot.lane.b32.xlu0 %v1612_v35, %s1704_s0  ;;  %v1007_v35 = vrot.slane %v1280_v49, 6  ;;  %v1097_v49 = vld [vmem:[#allocation2 + $0x130] sm:$0xff] }
 0xaed   :  { %v558_v51 = vpop.permute.xlu0 %557 }
 0xaee   :  { %v560_v52 = vmul.f32 %v1610_v44, %v558_v51  ;;  %v990_v44 = vld [vmem:[#allocation2 + $0xa8] sm:$0xff] }
 0xaf0   :  { %v562_v53 = vrot.slane %v560_v52, 6 }
 0xaf2   :  { %563 = vrot.lane.b32.xlu1 %v562_v53, %s1705_s1 }
 0xb64   :  { %v564_v54 = vpop.permute.xlu1 %563 }
 0xb65   :  { %1477 = vmatmul.mubr.msk.f32.vlgmr.msra.gmra.mxu1 %vm142_vm3, %v564_v54 }
 0xb66   :  { %1480 = vmatpush3.msra.mxu1 %v1735_v8  ;;  %1487 = vmatprep.mubr.msk.f32.mxu1 %vm1702_vm0, %v1701_v1 }
 0xb67   :  { %1481 = vmatprep.subr.mxu1 %v1701_v1 }
 0xb68   :  { %1482 = vmatpush3.msra.mxu1 %v1738_v10 }
 0xb69   :  { %1483 = vmatprep.subr.mxu1 %v1701_v1 }
 0xb6a   :  { %1484 = vmatpush3.msra.mxu1 %v1741_v11 }
 0xb6b   :  { %1485 = vmatprep.subr.mxu1 %v1701_v1 }
 0xb6c   :  { %1486 = vmatpush3.msra.mxu1 %v1745_v13 }
 0xb6d   :  { %1501 = vmatprep.subr.mxu1 %v1701_v1 }
 0xc25   :  { %v633_v55 = vpop.f32.mrf.mxu1 }
 0xc26   :  { %v637_v56 = vadd.f32 %v633_v55, %v1783_v33 }
 0xc27   :  { %v1478_v57 = vpop.f32.mrf.mxu1 }
 0xc28   :  { %1613 = vtanh.f32 %v637_v56  ;;  %v1292_v59 = vmul.f32 -1.442695, %v637_v56 }
 0xc2a   :  { %1615 = vpow2.f32 %v1292_v59 }
 0xc35   :  { %v1614_v58 = vpop.eup %1613 }
 0xc36   :  { %650 = vrot.lane.b32.xlu0 %v1614_v58, %s1704_s0 }
 0xc37   :  { %v1616_v60 = vpop.eup %1615 }
 0xc38   :  { %v641_v61 = vadd.f32 1.0, %v1616_v60 }
 0xc3a   :  { %1617 = vrcp.f32 %v641_v61 }
 0xc47   :  { %v1618_v62 = vpop.eup %1617 }
 0xc48   :  { %v648_v3 = vmul.f32 %v1618_v62, %v646_v2 }
 0xca8   :  { %v651_v63 = vpop.permute.xlu0 %650 }
 0xca9   :  { %v653_v0 = vmul.f32 %v1618_v62, %v651_v63 }
 0xcab   :  { %655 = vrot.lane.b32.xlu1 %v653_v0, %s1705_s1 }
 0xd1d   :  { %v656_v4 = vpop.permute.xlu1 %655 }
 0xd1e   :  { %v658_v5 = vadd.f32 %v656_v4, %v648_v3  ;;  %v1299_v4 = vld [vmem:[#allocation2 + $0x128] ss:$0 sm:$0xff] }
 0xd20   :  { %1619 = vtanh.f32 %v658_v5 }
 0xd2d   :  { %v1620_v6 = vpop.eup %1619 }
 0xd2e   :  { %661 = vrot.lane.b32.xlu0 %v1620_v6, %s1704_s0 }
 0xda0   :  { %v662_v7 = vpop.permute.xlu0 %661 }
 0xda1   :  { %v664_v9 = vmul.f32 %v1618_v62, %v662_v7 }
 0xda3   :  { %666 = vrot.lane.b32.xlu1 %v664_v9, %s1705_s1 }
 0xe15   :  { %v667_v12 = vpop.permute.xlu1 %666 }
 0xe16   :  { %1488 = vmatmul.mubr.msk.f32.vlgmr.msra.gmra.mxu1 %vm142_vm3, %v667_v12 }
 0xe17   :  { %1502 = vmatpush3.msra.mxu1 %v1735_v8  ;;  %1509 = vmatprep.mubr.msk.f32.mxu1 %vm1702_vm0, %v1701_v1 }
 0xe18   :  { %1503 = vmatprep.subr.mxu1 %v1701_v1 }
 0xe19   :  { %1504 = vmatpush3.msra.mxu1 %v1738_v10 }
 0xe1a   :  { %1505 = vmatprep.subr.mxu1 %v1701_v1 }
 0xe1b   :  { %1506 = vmatpush3.msra.mxu1 %v1741_v11 }
 0xe1c   :  { %1507 = vmatprep.subr.mxu1 %v1701_v1 }
 0xe1d   :  { %1508 = vmatpush3.msra.mxu1 %v1745_v13  ;;  %v752_v13 = vrot.slane %v658_v5, 6 }
 0xe1e   :  { %1547 = vmatprep.subr.mxu1 %v1701_v1 }
 0xed6   :  { %v736_v14 = vpop.f32.mrf.mxu1 }
 0xed7   :  { %v741_v15 = vrot.slane %v736_v14, 6 }
 0xed8   :  { %v1489_v8 = vpop.f32.mrf.mxu1 }
 0xed9   :  { %v743_v16 = vadd.f32 %v741_v15, %v1783_v33 }
 0xedb   :  { %1621 = vtanh.f32 %v743_v16  ;;  %v1294_v10 = vmul.f32 -1.442695, %v743_v16 }
 0xedd   :  { %1623 = vpow2.f32 %v1294_v10 }
 0xee8   :  { %v1622_v17 = vpop.eup %1621 }
 0xee9   :  { %756 = vrot.lane.b32.xlu0 %v1622_v17, %s1704_s0 }
 0xeea   :  { %v1624_v18 = vpop.eup %1623 }
 0xeeb   :  { %v747_v19 = vadd.f32 1.0, %v1624_v18 }
 0xeed   :  { %1625 = vrcp.f32 %v747_v19 }
 0xefa   :  { %v1626_v11 = vpop.eup %1625 }
 0xefb   :  { %v754_v22 = vmul.f32 %v1626_v11, %v752_v13  ;;  %v1101_v13 = vld [vmem:[#allocation2 + $0x150] sm:$0xff] }
 0xf5b   :  { %v757_v20 = vpop.permute.xlu0 %756 }
 0xf5c   :  { %v759_v21 = vmul.f32 %v1626_v11, %v757_v20  ;;  %v1103_v20 = vld [vmem:[#allocation2 + $0x160] sm:$0xff] }
 0xf5e   :  { %761 = vrot.lane.b32.xlu1 %v759_v21, %s1705_s1  ;;  %v1102_v21 = vld [vmem:[#allocation2 + $0x158] sm:$0xff] }
 0xfd0   :  { %v762_v23 = vpop.permute.xlu1 %761 }
 0xfd1   :  { %v1870_v24 = vadd.f32 %v762_v23, %v754_v22 }
 0xfd3   :  { %1627 = vtanh.f32 %v1870_v24  ;;  %v859_v62 = vrot.slane %v1870_v24, 6 }
 0xfe0   :  { %v1628_v26 = vpop.eup %1627 }
 0xfe1   :  { %767 = vrot.lane.b32.xlu0 %v1628_v26, %s1704_s0 }
0x1053   :  { %v768_v27 = vpop.permute.xlu0 %767 }
0x1054   :  { %v770_v29 = vmul.f32 %v1626_v11, %v768_v27  ;;  %v1104_v11 = vld [vmem:[#allocation2 + $0x168] sm:$0xff] }
0x1056   :  { %v772_v30 = vrot.slane %v770_v29, 2 }
0x1058   :  { %773 = vrot.lane.b32.xlu1 %v772_v30, %s1705_s1 }
0x10ca   :  { %v774_v32 = vpop.permute.xlu1 %773 }
0x10cb   :  { %1499 = vmatmul.mubr.msk.f32.vlgmr.msra.gmra.mxu0 %vm142_vm3, %v774_v32 }
0x10cc   :  { %1513 = vmatpush3.msra.mxu0 %v1000_v31  ;;  %1544 = vmatprep.mubr.msk.f32.mxu0 %vm1702_vm0, %v1701_v1 }
0x10cd   :  { %1514 = vmatprep.subr.mxu0 %v1701_v1 }
0x10ce   :  { %1515 = vmatpush3.msra.mxu0 %v999_v34 }
0x10cf   :  { %1516 = vmatprep.subr.mxu0 %v1701_v1 }
0x10d0   :  { %1517 = vmatpush3.msra.mxu0 %v998_v36 }
0x10d1   :  { %1518 = vmatprep.subr.mxu0 %v1701_v1 }
0x10d2   :  { %1519 = vmatpush3.msra.mxu0 %v997_v37 }
0x10d3   :  { %1520 = vmatprep.subr.mxu0 %v1701_v1 }
0x10d4   :  { %1521 = vmatpush3.msra.mxu0 %v996_v38 }
0x10d5   :  { %1522 = vmatprep.subr.mxu0 %v1701_v1 }
0x10d6   :  { %1523 = vmatpush3.msra.mxu0 %v995_v39 }
0x10d7   :  { %1524 = vmatprep.subr.mxu0 %v1701_v1 }
0x10d8   :  { %1525 = vmatpush3.msra.mxu0 %v994_v40 }
0x10d9   :  { %1526 = vmatprep.subr.mxu0 %v1701_v1 }
0x10da   :  { %1527 = vmatpush3.msra.mxu0 %v993_v41 }
0x10db   :  { %1528 = vmatprep.subr.mxu0 %v1701_v1 }
0x10dc   :  { %1529 = vmatpush3.msra.mxu0 %v992_v42 }
0x10dd   :  { %1530 = vmatprep.subr.mxu0 %v1701_v1 }
0x10de   :  { %1531 = vmatpush3.msra.mxu0 %v991_v43 }
0x10df   :  { %1532 = vmatprep.subr.mxu0 %v1701_v1 }
0x10e0   :  { %1533 = vmatpush3.msra.mxu0 %v990_v44 }
0x10e1   :  { %1534 = vmatprep.subr.mxu0 %v1701_v1 }
0x10e2   :  { %1535 = vmatpush3.msra.mxu0 %v989_v45  ;;  %v1100_v45 = vld [vmem:[#allocation2 + $0x148] sm:$0xff] }
0x10e3   :  { %1536 = vmatprep.subr.mxu0 %v1701_v1 }
0x10e4   :  { %1537 = vmatpush3.msra.mxu0 %v988_v46  ;;  %v1099_v46 = vld [vmem:[#allocation2 + $0x140] sm:$0xff] }
0x10e5   :  { %1538 = vmatprep.subr.mxu0 %v1701_v1 }
0x10e6   :  { %1539 = vmatpush3.msra.mxu0 %v987_v47  ;;  %v1098_v47 = vld [vmem:[#allocation2 + $0x138] sm:$0xff] }
0x10e7   :  { %1540 = vmatprep.subr.mxu0 %v1701_v1 }
0x10e8   :  { %1541 = vmatpush3.msra.mxu0 %v986_v48 }
0x10e9   :  { %1542 = vmatprep.subr.mxu0 %v1701_v1 }
0x10ea   :  { %1543 = vmatpush3.msra.mxu0 %v985_v50 }
0x10eb   :  { %1545 = vmatmul.mubr.f32.vlgmr.msra.gmra.mxu0 %v1007_v35 }
0x118b   :  { %v843_v51 = vpop.f32.mrf.mxu0 }
0x118c   :  { %v848_v52 = vrot.slane %v843_v51, 4 }
0x118d   :  { %v1500_v53 = vpop.f32.mrf.mxu0 }
0x118e   :  { %v850_v54 = vadd.f32 %v848_v52, %v1783_v33  ;;  %v1303_v53 = vld [vmem:[#allocation2 + $0x170] ss:$0 sm:$0xff] }
0x1190   :  { %1629 = vtanh.f32 %v850_v54  ;;  %v1296_v56 = vmul.f32 -1.442695, %v850_v54 }
0x1192   :  { %1631 = vpow2.f32 %v1296_v56 }
0x119d   :  { %v1630_v55 = vpop.eup %1629 }
0x119e   :  { %863 = vrot.lane.b32.xlu0 %v1630_v55, %s1704_s0 }
0x119f   :  { %v1632_v57 = vpop.eup %1631 }
0x11a0   :  { %v854_v58 = vadd.f32 1.0, %v1632_v57 }
0x11a2   :  { %1633 = vrcp.f32 %v854_v58 }
0x11ab   :  { %v1075_v25 = vpop.f32.mrf.mxu0 }
0x11ac   :  { %v1076_v5 = vadd.f32 %v1299_v4, %v1075_v25 }
0x11ad   :  { %v1546_v28 = vpop.f32.mrf.mxu0 }
0x11ae   :  { %v1300_v14 = vmul.f32 -1.442695, %v1076_v5 }
0x11af   :  { %v1634_v59 = vpop.eup %1633 }
0x11b0   :  { %v861_v63 = vmul.f32 %v1634_v59, %v859_v62 }
0x1210   :  { %v864_v60 = vpop.permute.xlu0 %863 }
0x1211   :  { %v866_v61 = vmul.f32 %v1634_v59, %v864_v60 }
0x1213   :  { %868 = vrot.lane.b32.xlu1 %v866_v61, %s1705_s1 }
0x1285   :  { %v869_v0 = vpop.permute.xlu1 %868 }
0x1286   :  { %v1901_v2 = vadd.f32 %v869_v0, %v861_v63 }
0x1288   :  { %1635 = vtanh.f32 %v1901_v2 }
0x1289   :  { %1637 = vtanh.f32 %v1076_v5 }
0x128a   :  { %1639 = vpow2.f32 %v1300_v14 }
0x1295   :  { %v1636_v3 = vpop.eup %1635 }
0x1296   :  { %874 = vrot.lane.b32.xlu0 %v1636_v3, %s1704_s0  ;;  %v1638_v12 = vpop.eup %1637 }
0x1297   :  { %v1640_v15 = vpop.eup %1639 }
0x1298   :  { %v1082_v8 = vadd.f32 1.0, %v1640_v15 }
0x129a   :  { %1641 = vrcp.f32 %v1082_v8 }
0x12a7   :  { %v1642_v17 = vpop.eup %1641 }
0x1308   :  { %v875_v6 = vpop.permute.xlu0 %874 }
0x1309   :  { %v877_v7 = vmul.f32 %v1634_v59, %v875_v6 }
0x130b   :  { %v879_v9 = vrot.slane %v877_v7, 4 }
0x130d   :  { %880 = vrot.lane.b32.xlu1 %v879_v9, %s1705_s1 }
0x1311   :  { %1087 = vrot.lane.b32.xlu1 %v1638_v12, %s1704_s0 }
0x137f   :  { %v881_v16 = vpop.permute.xlu1 %880 }
0x1380   :  { %1510 = vmatmul.mubr.msk.f32.vlgmr.msra.gmra.mxu1 %vm142_vm3, %v881_v16 }
0x1381   :  { %1555 = vmatprep.mubr.msk.f32.mxu1 %vm1702_vm0, %v1701_v1  ;;  %1548 = vmatpush3.msra.mxu1 %v1104_v11 }
0x1382   :  { %1549 = vmatprep.subr.mxu1 %v1701_v1 }
0x1383   :  { %v1088_v10 = vpop.permute.xlu1 %1087  ;;  %1550 = vmatpush3.msra.mxu1 %v1103_v20 }
0x1384   :  { %v1090_v18 = vmul.f32 %v1642_v17, %v1088_v10  ;;  %1551 = vmatprep.subr.mxu1 %v1701_v1 }
0x1385   :  { %1552 = vmatpush3.msra.mxu1 %v1102_v21 }
0x1386   :  { %1643 = vtanh.f32 %v1090_v18  ;;  %1553 = vmatprep.subr.mxu1 %v1701_v1 }
0x1387   :  { %1554 = vmatpush3.msra.mxu1 %v1101_v13 }
0x1388   :  { %1558 = vmatprep.subr.mxu1 %v1701_v1 }
0x1393   :  { %v1644_v19 = vpop.eup %1643 }
0x1394   :  { %1093 = vrot.lane.b32.xlu1 %v1644_v19, %s1706_s20 }
0x1406   :  { %v1094_v22 = vpop.permute.xlu1 %1093 }
0x1407   :  { %v1096_v23 = vmul.f32 %v1642_v17, %v1094_v22 }
0x1409   :  { %1107 = vrot.lane.b32.xlu1 %v1096_v23, %s1705_s1 }
0x1440   :  { %v950_v24 = vpop.f32.mrf.mxu1 }
0x1441   :  { %v955_v26 = vrot.slane %v950_v24, 2 }
0x1442   :  { %v1511_v27 = vpop.f32.mrf.mxu1 }
0x1443   :  { %v957_v29 = vadd.f32 %v955_v26, %v1783_v33  ;;  %v966_v33 = vrot.slane %v1901_v2, 6 }
0x1445   :  { %1645 = vtanh.f32 %v957_v29  ;;  %v1298_v32 = vmul.f32 -1.442695, %v957_v29 }
0x1447   :  { %1647 = vpow2.f32 %v1298_v32 }
0x1452   :  { %v1646_v30 = vpop.eup %1645 }
0x1453   :  { %970 = vrot.lane.b32.xlu0 %v1646_v30, %s1704_s0 }
0x1454   :  { %v1648_v34 = vpop.eup %1647 }
0x1455   :  { %v961_v36 = vadd.f32 1.0, %v1648_v34 }
0x1457   :  { %1649 = vrcp.f32 %v961_v36 }
0x1464   :  { %v1650_v37 = vpop.eup %1649 }
0x1465   :  { %v968_v40 = vmul.f32 %v1650_v37, %v966_v33 }
0x147b   :  { %v1108_v31 = vpop.permute.xlu1 %1107 }
0x147c   :  { %1556 = vmatmul.mubr.msk.f32.vlgmr.msra.gmra.mxu1 %vm142_vm3, %v1108_v31 }
0x147d   :  { %1566 = vmatprep.mubr.msk.f32.mxu1 %vm1702_vm0, %v1701_v1  ;;  %1559 = vmatpush3.msra.mxu1 %v1100_v45 }
0x147e   :  { %1560 = vmatprep.subr.mxu1 %v1701_v1 }
0x147f   :  { %1561 = vmatpush3.msra.mxu1 %v1099_v46 }
0x1480   :  { %1562 = vmatprep.subr.mxu1 %v1701_v1 }
0x1481   :  { %1563 = vmatpush3.msra.mxu1 %v1098_v47 }
0x1482   :  { %1564 = vmatprep.subr.mxu1 %v1701_v1 }
0x1483   :  { %1565 = vmatpush3.msra.mxu1 %v1097_v49 }
0x14c5   :  { %v971_v38 = vpop.permute.xlu0 %970 }
0x14c6   :  { %v973_v39 = vmul.f32 %v1650_v37, %v971_v38 }
0x14c8   :  { %975 = vrot.lane.b32.xlu0 %v973_v39, %s1705_s1 }
0x153a   :  { %v976_v41 = vpop.permute.xlu0 %975 }
0x153b   :  { %v978_v42 = vadd.f32 %v976_v41, %v968_v40 }
0x153c   :  { %v1177_v43 = vpop.f32.mrf.mxu1 }
0x153d   :  { %1651 = vtanh.f32 %v978_v42 }
0x153e   :  { %v1557_v44 = vpop.f32.mrf.mxu1 }
0x154a   :  { %v1652_v48 = vpop.eup %1651 }
0x154b   :  { %981 = vrot.lane.b32.xlu0 %v1652_v48, %s1704_s0 }
0x15bd   :  { %v982_v50 = vpop.permute.xlu0 %981 }
0x15be   :  { %v984_v35 = vmul.f32 %v1650_v37, %v982_v50 }
0x15c0   :  { %v1182_v51 = vrot.slane %v984_v35, 6 }
0x15c2   :  { %1183 = vrot.lane.b32.xlu0 %v1182_v51, %s1705_s1 }
0x1634   :  { %v1184_v52 = vpop.permute.xlu0 %1183 }
0x1635   :  { %1567 = vmatmul.mubr.msk.f32.vlgmr.msra.gmra.mxu1 %vm142_vm3, %v1184_v52 }
0x16f5   :  { %v1253_v54 = vpop.f32.mrf.mxu1 }
0x16f6   :  { %v1254_v55 = vadd.f32 %v1253_v54, %v1177_v43 }
0x16f7   :  { %v1568_v25 = vpop.f32.mrf.mxu1 }
0x16f8   :  { %v1261_v1 = vadd.f32 %v1303_v53, %v1254_v55 }
0x16fa   :  { %1263 = vst.msk [vmem:[#allocation5] sm:$0x3] %vm1262_vm4, %v1261_v1 }
0x16fb   :  { %1684 = shalt.err (!%p1681_p9)
}
0x16fc   :  { %1273 = dma.vmem_to_hbm [thread:$0]  %s1271_s22, 32, %s1933_s2, [#allocation4]  }
0x16fd   :  { %1695 = dma.done.wait [#allocation4], 32  }
0x16fe   :  { %1696 = vsyncadd [#allocation4], 4294967264 }
0x16ff   :  { %1277 = vsyncpa [#allocation3], 1 }
0x1700   :  { %1278 = vsyncpa [#allocation4], 1 }

</bundles_post_ra>
